<compile_context>
chip_gen: v6e
topology: v6e:2x2x1
jax: 0.10.0
libtpu: 0.0.40
codegen_flags: <defaults>
</compile_context>

<pallas_src>
import math
from functools import partial

import jax
import jax.numpy as jnp
from jax.experimental import pallas as pl
from jax.experimental.pallas import tpu as pltpu


def _sinusoidal_kernel(t_ref, f_ref, o_ref, *, half_dim: int, pack: int):
    """Compute sinusoidal position embeddings for one tile.

    t_ref: (TB, pack)            f32  -- `pack` batch entries per packed row
    f_ref: (1, half_dim)         f32  -- precomputed frequencies (resident)
    o_ref: (TB, pack * 2*half_dim) out dtype
    """
    dim = 2 * half_dim
    freqs = f_ref[...]                       # (1, half_dim)
    t = t_ref[...]                           # (TB, pack), already f32
    # Static (unrolled) loop over the lane-packing factor.
    for j in range(pack):
        args = t[:, j:j + 1] * freqs         # (TB, half_dim) outer product via broadcast
        o_ref[:, j * dim: j * dim + half_dim] = jnp.sin(args).astype(o_ref.dtype)
        o_ref[:, j * dim + half_dim: (j + 1) * dim] = jnp.cos(args).astype(o_ref.dtype)


def sinusoidal_position_embeddings(time: jax.Array, dim: int,
                                   out_dtype=jnp.float32) -> jax.Array:
    """JAX wrapper: time (B,) -> embeddings (B, dim)."""
    assert dim % 2 == 0 and dim >= 4, "dim must be even and >= 4"
    b = time.shape[0]
    half_dim = dim // 2

    # Precompute freqs on the host side of the kernel (constant-folded by XLA).
    scale = math.log(10000.0) / (half_dim - 1)
    freqs = jnp.exp(jnp.arange(half_dim, dtype=jnp.float32) * (-scale))
    freqs = freqs.reshape(1, half_dim)

    # Lane-packing: make each output row a multiple of 128 lanes when dim < 128.
    pack = 1
    if dim < 128 and 128 % dim == 0:
        cand = 128 // dim
        while cand > 1 and b % cand != 0:
            cand //= 2
        pack = max(cand, 1)
    rows = b // pack

    t2d = time.astype(jnp.float32).reshape(rows, pack)

    # Row tiling: full extent for small inputs, 512-row tiles (multiple of 8) otherwise.
    if rows <= 512:
        tb = rows
        grid = (1,)
    else:
        tb = 512
        grid = (pl.cdiv(rows, tb),)

    out_packed = pl.pallas_call(
        partial(_sinusoidal_kernel, half_dim=half_dim, pack=pack),
        out_shape=jax.ShapeDtypeStruct((rows, pack * dim), out_dtype),
        grid=grid,
        in_specs=[
            pl.BlockSpec((tb, pack), lambda i: (i, 0)),         # packed time rows
            pl.BlockSpec((1, half_dim), lambda i: (0, 0)),      # resident freqs
        ],
        out_specs=pl.BlockSpec((tb, pack * dim), lambda i: (i, 0)),
        compiler_params=pltpu.CompilerParams(
            dimension_semantics=("parallel",)),
    )(t2d, freqs)

    return out_packed.reshape(b, dim)


def _reference(time: jax.Array, dim: int) -> jax.Array:
    half_dim = dim // 2
    scale = math.log(10000.0) / (half_dim - 1)
    freqs = jnp.exp(jnp.arange(half_dim, dtype=jnp.float32) * (-scale))
    args = time.astype(jnp.float32)[:, None] * freqs[None, :]
    return jnp.concatenate([jnp.sin(args), jnp.cos(args)], axis=-1)


if __name__ == "__main__":
    key = jax.random.PRNGKey(0)
    batch = 8
    dim = 32
    # diffusion timesteps: small positive values
    time = jax.random.uniform(key, (batch,), dtype=jnp.float32,
                              minval=0.0, maxval=1000.0)

    out = sinusoidal_position_embeddings(time, dim)
    out = jax.block_until_ready(out)

    ref = _reference(time, dim)
    assert out.shape == (batch, dim)
    assert out.dtype == jnp.float32
    assert jnp.allclose(out, ref, atol=1e-5, rtol=1e-5), "mismatch vs reference"

    print("KERNEL_OK")
</pallas_src>

<mosaic_0001>
module attributes {stable_mosaic.version = 11 : i64} {
  func.func @_sinusoidal_kernel(%arg0: i32, %arg1: memref<2x4xf32, #tpu.memory_space<vmem>>, %arg2: memref<1x16xf32, #tpu.memory_space<vmem>>, %arg3: memref<2x128xf32, #tpu.memory_space<vmem>>) attributes {dimension_semantics = [#tpu.dimension_semantics<parallel>], iteration_bounds = array<i64: 1>, scalar_prefetch = 0 : i64, scratch_operands = 0 : i64, tpu.core_type = #tpu.core_type<tc>, window_params = [{transform_indices = @transform_0, window_bounds = array<i64: 2, 4>}, {pipeline_mode = #tpu.pipeline_mode<synchronous>, transform_indices = @transform_1, window_bounds = array<i64: 1, 16>}, {transform_indices = @transform_2, window_bounds = array<i64: 2, 128>}]} {
    %c0 = arith.constant 0 : index
    %c0_0 = arith.constant 0 : index
    %0 = vector.load %arg2[%c0, %c0_0] : memref<1x16xf32, #tpu.memory_space<vmem>>, vector<1x16xf32>
    %c0_1 = arith.constant 0 : index
    %c0_2 = arith.constant 0 : index
    %1 = vector.load %arg1[%c0_1, %c0_2] : memref<2x4xf32, #tpu.memory_space<vmem>>, vector<2x4xf32>
    %2 = vector.extract_strided_slice %1 {offsets = [0, 0], sizes = [2, 1], strides = [1, 1]} : vector<2x4xf32> to vector<2x1xf32>
    %3 = vector.broadcast %2 : vector<2x1xf32> to vector<2x16xf32>
    %4 = vector.broadcast %0 : vector<1x16xf32> to vector<2x16xf32>
    %5 = arith.mulf %3, %4 : vector<2x16xf32>
    %6 = math.sin %5 : vector<2x16xf32>
    %c0_3 = arith.constant 0 : index
    %c0_4 = arith.constant 0 : index
    %7 = vector.load %arg3[%c0_3, %c0_4] : memref<2x128xf32, #tpu.memory_space<vmem>>, vector<2x16xf32>
    tpu.vector_store %arg3[%c0_3, %c0_4], %6 {strides = array<i32>} : memref<2x128xf32, #tpu.memory_space<vmem>>, vector<2x16xf32>,
    %8 = math.cos %5 : vector<2x16xf32>
    %c0_5 = arith.constant 0 : index
    %c16 = arith.constant 16 : index
    %9 = vector.load %arg3[%c0_5, %c16] : memref<2x128xf32, #tpu.memory_space<vmem>>, vector<2x16xf32>
    tpu.vector_store %arg3[%c0_5, %c16], %8 {strides = array<i32>} : memref<2x128xf32, #tpu.memory_space<vmem>>, vector<2x16xf32>,
    %10 = vector.extract_strided_slice %1 {offsets = [0, 1], sizes = [2, 1], strides = [1, 1]} : vector<2x4xf32> to vector<2x1xf32>
    %11 = vector.broadcast %10 : vector<2x1xf32> to vector<2x16xf32>
    %12 = vector.broadcast %0 : vector<1x16xf32> to vector<2x16xf32>
    %13 = arith.mulf %11, %12 : vector<2x16xf32>
    %14 = math.sin %13 : vector<2x16xf32>
    %c0_6 = arith.constant 0 : index
    %c32 = arith.constant 32 : index
    %15 = vector.load %arg3[%c0_6, %c32] : memref<2x128xf32, #tpu.memory_space<vmem>>, vector<2x16xf32>
    tpu.vector_store %arg3[%c0_6, %c32], %14 {strides = array<i32>} : memref<2x128xf32, #tpu.memory_space<vmem>>, vector<2x16xf32>,
    %16 = math.cos %13 : vector<2x16xf32>
    %c0_7 = arith.constant 0 : index
    %c48 = arith.constant 48 : index
    %17 = vector.load %arg3[%c0_7, %c48] : memref<2x128xf32, #tpu.memory_space<vmem>>, vector<2x16xf32>
    tpu.vector_store %arg3[%c0_7, %c48], %16 {strides = array<i32>} : memref<2x128xf32, #tpu.memory_space<vmem>>, vector<2x16xf32>,
    %18 = vector.extract_strided_slice %1 {offsets = [0, 2], sizes = [2, 1], strides = [1, 1]} : vector<2x4xf32> to vector<2x1xf32>
    %19 = vector.broadcast %18 : vector<2x1xf32> to vector<2x16xf32>
    %20 = vector.broadcast %0 : vector<1x16xf32> to vector<2x16xf32>
    %21 = arith.mulf %19, %20 : vector<2x16xf32>
    %22 = math.sin %21 : vector<2x16xf32>
    %c0_8 = arith.constant 0 : index
    %c64 = arith.constant 64 : index
    %23 = vector.load %arg3[%c0_8, %c64] : memref<2x128xf32, #tpu.memory_space<vmem>>, vector<2x16xf32>
    tpu.vector_store %arg3[%c0_8, %c64], %22 {strides = array<i32>} : memref<2x128xf32, #tpu.memory_space<vmem>>, vector<2x16xf32>,
    %24 = math.cos %21 : vector<2x16xf32>
    %c0_9 = arith.constant 0 : index
    %c80 = arith.constant 80 : index
    %25 = vector.load %arg3[%c0_9, %c80] : memref<2x128xf32, #tpu.memory_space<vmem>>, vector<2x16xf32>
    tpu.vector_store %arg3[%c0_9, %c80], %24 {strides = array<i32>} : memref<2x128xf32, #tpu.memory_space<vmem>>, vector<2x16xf32>,
    %26 = vector.extract_strided_slice %1 {offsets = [0, 3], sizes = [2, 1], strides = [1, 1]} : vector<2x4xf32> to vector<2x1xf32>
    %27 = vector.broadcast %26 : vector<2x1xf32> to vector<2x16xf32>
    %28 = vector.broadcast %0 : vector<1x16xf32> to vector<2x16xf32>
    %29 = arith.mulf %27, %28 : vector<2x16xf32>
    %30 = math.sin %29 : vector<2x16xf32>
    %c0_10 = arith.constant 0 : index
    %c96 = arith.constant 96 : index
    %31 = vector.load %arg3[%c0_10, %c96] : memref<2x128xf32, #tpu.memory_space<vmem>>, vector<2x16xf32>
    tpu.vector_store %arg3[%c0_10, %c96], %30 {strides = array<i32>} : memref<2x128xf32, #tpu.memory_space<vmem>>, vector<2x16xf32>,
    %32 = math.cos %29 : vector<2x16xf32>
    %c0_11 = arith.constant 0 : index
    %c112 = arith.constant 112 : index
    %33 = vector.load %arg3[%c0_11, %c112] : memref<2x128xf32, #tpu.memory_space<vmem>>, vector<2x16xf32>
    tpu.vector_store %arg3[%c0_11, %c112], %32 {strides = array<i32>} : memref<2x128xf32, #tpu.memory_space<vmem>>, vector<2x16xf32>,
    return
  }
  func.func @transform_0(%arg0: i32) -> (i32, i32) {
    %c0_i32 = arith.constant 0 : i32
    %c0_i32_0 = arith.constant 0 : i32
    return %arg0, %c0_i32 : i32, i32
  }
  func.func @transform_1(%arg0: i32) -> (i32, i32) {
    %c0_i32 = arith.constant 0 : i32
    %c0_i32_0 = arith.constant 0 : i32
    %c0_i32_1 = arith.constant 0 : i32
    return %c0_i32, %c0_i32_0 : i32, i32
  }
  func.func @transform_2(%arg0: i32) -> (i32, i32) {
    %c0_i32 = arith.constant 0 : i32
    %c0_i32_0 = arith.constant 0 : i32
    return %arg0, %c0_i32 : i32, i32
  }
}

</mosaic_0001>

<bundles_post_ra>
// kernel: tpu_custom_call.1
= control target key start
LH: loop header
LB: loop body
LE: loop exit
PB: predicated region body
PF: predicated region fallthrough
CT: control target
= control target key end

     0   :  { %7 = vsyncpa [#allocation3], 0  ;;  %s1401_s0 = inlined_call_operand.hbm [shape: f32[2,4], index: 0, kind: input, shape index: {}]   ;;  %s1402_s1 = inlined_call_operand.vmem [shape: f32[1,16], index: 1, kind: input, shape index: {}]   ;;  %s1403_s2 = inlined_call_operand.hbm [shape: f32[2,128], index: 2, kind: output, shape index: {}]  }
   0x1   :  { %8 = vsyncpa [#allocation4], 0  ;;  %s1073_s9 = smov [#allocation2]  }
   0x2   :  { %s15_s10 = sshll.u32 %s1073_s9, 4  ;;  %s16_s10 = int_to_ptr.vmem [resolvable:$true] %s15_s10 }
   0x3   :  { %s1037_s11 = scalar_lea.vmem %s16_s10, 32  ;;  %p1042_p1 = scmp.lt.s32.totalorder %s16_s10, %s16_s10 }
   0x4   :  { %p1038_p0 = scmp.ne.s32.totalorder %s16_s10, %s1037_s11  ;;  %p1043_p2 = scmp.lt.s32.totalorder %s1037_s11, %s1037_s11 }
   0x6   :  { %p1044_p3 = por %p1043_p2, %p1042_p1 }
   0x8   :  { %p1045_p4 = pnand %p1044_p3, %p1038_p0 }
   0xa   :  { %1048 = shalt.err (!%p1045_p4)
}
   0xb   :  { %18 = dma.hbm_to_vmem [thread:$0]  %s1401_s0, 32, %s16_s10, [#allocation3]  }
   0xc   :  { %1069 = dma.done.wait [#allocation3], 32  }
   0xd   :  { %1070 = vsyncadd [#allocation3], 4294967264  ;;  %v1074_v0 = vmov 2   ;;  %v1075_v1 = vmov 0   ;;  %v25_v2 = vld [vmem:[#allocation2] sm:$0x3] }
   0xe   :  { %1010 = vset.pattern.permute.xlu1 %v1074_v0  ;;  %1008 = vset.pattern.permute.xlu0 %v1075_v1  ;;  %v1076_v3 = vmov 3   ;;  %v1077_v4 = vmov 1   ;;  %v940_v5 = vld [vmem:[%s1402_s1] ss:$0 sm:$0xff]  ;;  %v1078_v42 = vmov 683565275  }
   0xf   :  { %478 = vperm.xlu1 %1010, %v25_v2   ;;  %28 = vperm.xlu0 %1008, %v25_v2   ;;  %v1079_v44 = vmov 2475754826   ;;  %v1080_v46 = vmov 2131351028   ;;  %v1081_v48 = vmov 2102212464  }
  0x10   :  { %v1082_v50 = vmov 920167782   ;;  %v1083_v58 = vmov 1326507024   ;;  %s1084_s0 = smov 16   ;;  %s1085_s1 = smov 32  }
  0x11   :  { %s1086_s16 = smov 48   ;;  %s1087_s17 = smov 64  }
  0x12   :  { %s1088_s18 = smov 80   ;;  %s1089_s19 = smov 96  }
  0x13   :  { %1011 = vset.pattern.permute.xlu1 %v1076_v3  ;;  %1009 = vset.pattern.permute.xlu0 %v1077_v4  ;;  %s1090_s20 = smov 112   ;;  %s1091_s21 = smov [#allocation5]  }
  0x14   :  { %702 = vperm.xlu1 %1011, %v25_v2   ;;  %254 = vperm.xlu0 %1009, %v25_v2   ;;  %s931_s22 = sshll.u32 %s1091_s21, 4  ;;  %s932_s22 = int_to_ptr.vmem [resolvable:$true] %s931_s22 }
  0x15   :  { %s1049_s23 = scalar_lea.vmem %s932_s22, 32  ;;  %p1054_p6 = scmp.lt.s32.totalorder %s932_s22, %s932_s22 }
  0x16   :  { %p1050_p5 = scmp.ne.s32.totalorder %s932_s22, %s1049_s23  ;;  %p1055_p7 = scmp.lt.s32.totalorder %s1049_s23, %s1049_s23 }
  0x18   :  { %1012 = vset.pattern.permute.xlu0 %v1076_v3  ;;  %p1056_p8 = por %p1055_p7, %p1054_p6 }
  0x1a   :  { %p1057_p9 = pnand %p1056_p8, %p1050_p5 }
  0x8a   :  { %v479_v6 = vpop.permute.xlu1 %478  ;;  %v29_v7 = vpop.permute.xlu0 %28 }
  0x8b   :  { %v1113_v8 = vmul.f32 %v940_v5, %v479_v6  ;;  %v1115_v9 = vmul.f32 %v940_v5, %v29_v7 }
  0x8d   :  { %v482_v10 = vand.u32 2147483647, %v1113_v8  ;;  %v485_v11 = vand.u32 2139095040, %v1113_v8  ;;  %v38_v12 = vand.u32 2147483647, %v1115_v9  ;;  %v41_v13 = vand.u32 2139095040, %v1115_v9 }
  0x8f   :  { %v486_v14 = vshrl.u32 %v485_v11, 23  ;;  %v489_v15 = vand.u32 8388607, %v482_v10  ;;  %v45_v16 = vand.u32 8388607, %v38_v12  ;;  %v703_v17 = vpop.permute.xlu1 %702  ;;  %v42_v18 = vshrl.u32 %v41_v13, 23  ;;  %v255_v21 = vpop.permute.xlu0 %254 }
  0x90   :  { %v1125_v19 = vmul.f32 %v940_v5, %v703_v17  ;;  %v1129_v30 = vmul.f32 %v940_v5, %v255_v21 }
  0x91   :  { %v957_v20 = vadd.s32 4294967169, %v486_v14  ;;  %v490_v22 = vor.u32 8388608, %v489_v15  ;;  %v941_v23 = vadd.s32 4294967169, %v42_v18  ;;  %v46_v26 = vor.u32 8388608, %v45_v16 }
  0x92   :  { %v709_v24 = vand.u32 2139095040, %v1125_v19  ;;  %v706_v28 = vand.u32 2147483647, %v1125_v19  ;;  %v261_v40 = vand.u32 2139095040, %v1129_v30 }
  0x93   :  { %v492_v25 = vadd.s32 1, %v957_v20  ;;  %v48_v27 = vadd.s32 1, %v941_v23  ;;  %v1131_v32 = vshll.u32 %v490_v22, 8  ;;  %v1133_v36 = vshll.u32 %v46_v26, 8 }
  0x94   :  { %v710_v29 = vshrl.u32 %v709_v24, 23  ;;  %v1139_v39 = vand.u32 8388607, %v706_v28 }
  0x95   :  { %vm493_vm0 = vcmp.gt.s32.totalorder %v492_v25, 0  ;;  %vm49_vm1 = vcmp.gt.s32.totalorder %v48_v27, 0 }
  0x96   :  { %v494_v31 = vsel %vm493_vm0, %v492_v25, 0  ;;  %v50_v35 = vsel %vm49_vm1, %v48_v27, 0  ;;  %v965_v38 = vadd.s32 4294967169, %v710_v29 }
  0x97   :  { %v495_v33 = vshrl.u32 %v494_v31, 5  ;;  %v496_v34 = vand.u32 31, %v494_v31  ;;  %v1135_v37 = vand.u32 31, %v50_v35  ;;  %v1147_v52 = vshrl.u32 %v50_v35, 5 }
  0x98   :  { %v716_v2 = vadd.s32 1, %v965_v38 }
  0x99   :  { %v497_v41 = vsub.s32 32, %v496_v34  ;;  %v499_v43 = vshll.u32 %v1078_v42, %v496_v34  ;;  %v502_v45 = vshll.u32 %v1079_v44, %v496_v34  ;;  %v505_v47 = vshll.u32 %v1080_v46, %v496_v34 }
  0x9a   :  { %v508_v49 = vshll.u32 %v1081_v48, %v496_v34  ;;  %v511_v51 = vshll.u32 %v1082_v50, %v496_v34  ;;  %vm514_vm2 = vcmp.lt.s32.totalorder %v495_v33, 1  ;;  %vm516_vm3 = vcmp.lt.s32.totalorder %v495_v33, 3 }
  0x9b   :  { %v498_v53 = vshrl.u32 %v1078_v42, %v497_v41  ;;  %v500_v54 = vshrl.u32 %v1079_v44, %v497_v41  ;;  %v503_v55 = vshrl.u32 %v1080_v46, %v497_v41  ;;  %v506_v56 = vshrl.u32 %v1081_v48, %v497_v41 }
  0x9c   :  { %v509_v57 = vshrl.u32 %v1082_v50, %v497_v41  ;;  %v512_v59 = vshrl.u32 %v1083_v58, %v497_v41  ;;  %vm517_vm4 = vcmp.lt.s32.totalorder %v495_v33, 4  ;;  %v53_v63 = vsub.s32 32, %v1135_v37 }
  0x9d   :  { %v501_v60 = vor.u32 %v500_v54, %v499_v43  ;;  %v504_v61 = vor.u32 %v503_v55, %v502_v45  ;;  %v507_v62 = vor.u32 %v506_v56, %v505_v47  ;;  %vm515_vm5 = vcmp.lt.s32.totalorder %v495_v33, 2 }
  0x9e   :  { %v510_v0 = vor.u32 %v509_v57, %v508_v49  ;;  %v513_v1 = vor.u32 %v512_v59, %v511_v51  ;;  %v55_v14 = vshll.u32 %v1078_v42, %v1135_v37  ;;  %v56_v17 = vshrl.u32 %v1079_v44, %v53_v63 }
  0x9f   :  { %v518_v3 = vsel %vm514_vm2, %v498_v53, %v501_v60  ;;  %v519_v4 = vsel %vm517_vm4, %v507_v62, 2102212464  ;;  %v522_v5 = vsel %vm514_vm2, %v501_v60, %v504_v61  ;;  %v526_v6 = vsel %vm514_vm2, %v504_v61, %v507_v62 }
  0xa0   :  { %v520_v7 = vsel %vm516_vm3, %v504_v61, %v519_v4  ;;  %v523_v11 = vsel %vm517_vm4, %v510_v0, 920167782  ;;  %v527_v13 = vsel %vm517_vm4, %v513_v1, 1326507024  ;;  %v58_v18 = vshll.u32 %v1079_v44, %v1135_v37 }
  0xa1   :  { %v524_v15 = vsel %vm516_vm3, %v507_v62, %v523_v11  ;;  %v528_v16 = vsel %vm516_vm3, %v510_v0, %v527_v13  ;;  %v521_v20 = vsel %vm515_vm5, %v518_v3, %v520_v7  ;;  %v59_v23 = vshrl.u32 %v1080_v46, %v53_v63 }
  0xa2   :  { %v525_v21 = vsel %vm515_vm5, %v522_v5, %v524_v15  ;;  %v529_v22 = vsel %vm515_vm5, %v526_v6, %v528_v16  ;;  %v57_v29 = vor.u32 %v56_v17, %v55_v14  ;;  %v61_v34 = vshll.u32 %v1080_v46, %v1135_v37 }
  0xa3   :  { %v1172_v24 = vmul.u32.u64.low %v1131_v32, %v529_v22  ;;  %v1173_v25 = vmul.u32.u64.high %v1131_v32, %v529_v22, %v1172_v24  ;;  %v1176_v26 = vmul.u32.u64.low %v1131_v32, %v525_v21  ;;  %v1177_v27 = vmul.u32.u64.high %v1131_v32, %v525_v21, %v1176_v26 }
  0xa4   :  { %v60_v31 = vor.u32 %v59_v23, %v58_v18  ;;  %v62_v35 = vshrl.u32 %v1081_v48, %v53_v63  ;;  %v54_v33 = vshrl.u32 %v1078_v42, %v53_v63  ;;  %v64_v38 = vshll.u32 %v1081_v48, %v1135_v37 }
  0xa5   :  { %v65_v41 = vshrl.u32 %v1082_v50, %v53_v63  ;;  %v68_v43 = vshrl.u32 %v1083_v58, %v53_v63  ;;  %v537_v45 = vmul.u32 %v1131_v32, %v521_v20  ;;  %v67_v49 = vshll.u32 %v1082_v50, %v1135_v37 }
  0xa6   :  { %v63_v47 = vor.u32 %v62_v35, %v61_v34  ;;  %vm70_vm6 = vcmp.lt.s32.totalorder %v1147_v52, 1  ;;  %vm539_vm7 = vc.u32 %v1173_v25, %v1176_v26  ;;  %v540_v51 = vadd.s32 1, %v1177_v27 }
  0xa7   :  { %v66_v53 = vor.u32 %v65_v41, %v64_v38  ;;  %vm71_vm8 = vcmp.lt.s32.totalorder %v1147_v52, 2  ;;  %v69_v54 = vor.u32 %v68_v43, %v67_v49  ;;  %vm72_vm9 = vcmp.lt.s32.totalorder %v1147_v52, 3 }
  0xa8   :  { %vm73_vm10 = vcmp.lt.s32.totalorder %v1147_v52, 4  ;;  %v78_v32 = vsel %vm70_vm6, %v57_v29, %v60_v31  ;;  %v541_v55 = vsel %vm539_vm7, %v540_v51, %v1177_v27  ;;  %v82_v57 = vsel %vm70_vm6, %v60_v31, %v63_v47 }
  0xa9   :  { %v75_v56 = vsel %vm73_vm10, %v63_v47, 2102212464  ;;  %v79_v37 = vsel %vm73_vm10, %v66_v53, 920167782  ;;  %v542_v59 = vadd.s32 %v541_v55, %v537_v45  ;;  %v74_v60 = vsel %vm70_vm6, %v54_v33, %v57_v29 }
  0xaa   :  { %v80_v61 = vsel %vm72_vm9, %v63_v47, %v79_v37  ;;  %v83_v62 = vsel %vm73_vm10, %v69_v54, 1326507024  ;;  %v76_v63 = vsel %vm72_vm9, %v60_v31, %v75_v56  ;;  %vm717_vm11 = vcmp.gt.s32.totalorder %v716_v2, 0 }
  0xab   :  { %v81_v0 = vsel %vm71_vm8, %v78_v32, %v80_v61  ;;  %v84_v1 = vsel %vm72_vm9, %v66_v53, %v83_v62  ;;  %v543_v3 = vadd.s32 536870912, %v542_v59  ;;  %v718_v13 = vsel %vm717_vm11, %v716_v2, 0 }
  0xac   :  { %v85_v4 = vsel %vm71_vm8, %v82_v57, %v84_v1  ;;  %v1204_v5 = vmul.u32.u64.low %v1133_v36, %v81_v0  ;;  %v1205_v6 = vmul.u32.u64.high %v1133_v36, %v81_v0, %v1204_v5  ;;  %v77_v15 = vsel %vm71_vm8, %v74_v60, %v76_v63 }
  0xad   :  { %v1209_v7 = vmul.u32.u64.low %v1133_v36, %v85_v4  ;;  %v1210_v11 = vmul.u32.u64.high %v1133_v36, %v85_v4, %v1209_v7  ;;  %v1212_v14 = vshrl.u32 %v543_v3, 30  ;;  %v720_v16 = vand.u32 31, %v718_v13 }
  0xae   :  { %v714_v17 = vor.u32 8388608, %v1139_v39  ;;  %v258_v18 = vand.u32 2147483647, %v1129_v30  ;;  %v262_v20 = vshrl.u32 %v261_v40, 23  ;;  %v96_v22 = vadd.s32 1, %v1205_v6 }
  0xaf   :  { %v545_v21 = vshll.u32 %v1212_v14, 30  ;;  %v721_v23 = vsub.s32 32, %v720_v16  ;;  %v723_v2 = vshll.u32 %v1078_v42, %v720_v16  ;;  %v93_v24 = vmul.u32 %v1133_v36, %v77_v15 }
  0xb0   :  { %vm95_vm12 = vc.u32 %v1210_v11, %v1204_v5  ;;  %v726_v52 = vshll.u32 %v1079_v44, %v720_v16  ;;  %v729_v39 = vshll.u32 %v1080_v46, %v720_v16  ;;  %v719_v29 = vshrl.u32 %v718_v13, 5 }
  0xb1   :  { %v1228_v27 = vsub.s32 %v542_v59, %v545_v21  ;;  %v97_v40 = vsel %vm95_vm12, %v96_v22, %v1205_v6  ;;  %v724_v31 = vshrl.u32 %v1079_v44, %v721_v23  ;;  %v727_v35 = vshrl.u32 %v1080_v46, %v721_v23 }
  0xb2   :  { %v98_v34 = vadd.s32 %v97_v40, %v93_v24  ;;  %v730_v33 = vshrl.u32 %v1081_v48, %v721_v23  ;;  %v732_v36 = vshll.u32 %v1081_v48, %v720_v16  ;;  %v733_v43 = vshrl.u32 %v1082_v50, %v721_v23 }
  0xb3   :  { %v548_v38 = vsub.s32 0, %v1228_v27  ;;  %v725_v41 = vor.u32 %v724_v31, %v723_v2  ;;  %v735_v45 = vshll.u32 %v1082_v50, %v720_v16  ;;  %v728_v49 = vor.u32 %v727_v35, %v726_v52 }
  0xb4   :  { %v99_v47 = vadd.s32 536870912, %v98_v34  ;;  %v731_v51 = vor.u32 %v730_v33, %v729_v39  ;;  %v736_v53 = vshrl.u32 %v1083_v58, %v721_v23  ;;  %v722_v32 = vshrl.u32 %v1078_v42, %v721_v23 }
  0xb5   :  { %v958_v54 = vmin.u32 %v548_v38, %v1228_v27  ;;  %v734_v55 = vor.u32 %v733_v43, %v732_v36  ;;  %vm738_vm13 = vcmp.lt.s32.totalorder %v719_v29, 1  ;;  %vm740_vm14 = vcmp.lt.s32.totalorder %v719_v29, 3 }
  0xb6   :  { %v1241_v56 = vshrl.u32 %v99_v47, 30  ;;  %v737_v37 = vor.u32 %v736_v53, %v735_v45  ;;  %vm741_vm15 = vcmp.lt.s32.totalorder %v719_v29, 4  ;;  %vm739_vm0 = vcmp.lt.s32.totalorder %v719_v29, 2 }
  0xb7   :  { %v550_v57 = vclz %v958_v54  ;;  %v743_v59 = vsel %vm741_vm15, %v731_v51, 2102212464  ;;  %v746_v60 = vsel %vm738_vm13, %v725_v41, %v728_v49  ;;  %v747_v62 = vsel %vm741_vm15, %v734_v55, 920167782 }
  0xb8   :  { %v101_v61 = vshll.u32 %v1241_v56, 30  ;;  %v750_v63 = vsel %vm738_vm13, %v728_v49, %v731_v51  ;;  %v754_v0 = vshll.u32 %v714_v17, 8  ;;  %v742_v1 = vsel %vm738_vm13, %v722_v32, %v725_v41 }
  0xb9   :  { %v748_v3 = vsel %vm740_vm14, %v731_v51, %v747_v62  ;;  %v751_v4 = vsel %vm741_vm15, %v737_v37, 1326507024  ;;  %v949_v6 = vadd.s32 4294967169, %v262_v20  ;;  %v744_v13 = vsel %vm740_vm14, %v728_v49, %v743_v59 }
  0xba   :  { %v102_v7 = vsub.s32 %v98_v34, %v101_v61  ;;  %v749_v15 = vsel %vm739_vm0, %v746_v60, %v748_v3  ;;  %v752_v16 = vsel %vm740_vm14, %v734_v55, %v751_v4  ;;  %v959_v21 = vadd.s32 4294967294, %v550_v57 }
  0xbb   :  { %v753_v22 = vsel %vm739_vm0, %v750_v63, %v752_v16  ;;  %v1249_v23 = vmul.u32.u64.low %v754_v0, %v749_v15  ;;  %v1250_v2 = vmul.u32.u64.high %v754_v0, %v749_v15, %v1249_v23  ;;  %v745_v20 = vsel %vm739_vm0, %v742_v1, %v744_v13 }
  0xbc   :  { %v104_v17 = vsub.s32 0, %v102_v7  ;;  %v1253_v24 = vmul.u32.u64.low %v754_v0, %v753_v22  ;;  %v1254_v52 = vmul.u32.u64.high %v754_v0, %v753_v22, %v1253_v24  ;;  %v268_v39 = vadd.s32 1, %v949_v6 }
  0xbd   :  { %vm960_vm1 = vcmp.lt.s32.totalorder %v959_v21, 0  ;;  %v764_v31 = vadd.s32 1, %v1250_v2  ;;  %v265_v34 = vand.u32 8388607, %v258_v18  ;;  %v761_v33 = vmul.u32 %v754_v0, %v745_v20 }
  0xbe   :  { %v942_v40 = vmin.u32 %v104_v17, %v102_v7  ;;  %vm269_vm2 = vcmp.gt.s32.totalorder %v268_v39, 0  ;;  %vm763_vm3 = vc.u32 %v1254_v52, %v1249_v23  ;;  %v1263_v41 = vsel %vm960_vm1, 0, %v959_v21 }
  0xbf   :  { %v270_v36 = vsel %vm269_vm2, %v268_v39, 0  ;;  %v765_v38 = vsel %vm763_vm3, %v764_v31, %v1250_v2  ;;  %v266_v49 = vor.u32 8388608, %v265_v34  ;;  %v558_v53 = vsub.s32 4294967266, %v1263_v41 }
  0xc0   :  { %v106_v35 = vclz %v942_v40  ;;  %v766_v43 = vadd.s32 %v765_v38, %v761_v33  ;;  %v272_v45 = vand.u32 31, %v270_v36  ;;  %v94_v54 = vadd.s32 %v1204_v5, %v1210_v11 }
  0xc1   :  { %v271_v55 = vshrl.u32 %v270_v36, 5  ;;  %v306_v15 = vshll.u32 %v266_v49, 8  ;;  %vm40_vm5 = vcmp.lt.s32.totalorder %v1115_v9, 0  ;;  %vm1305_vm11 = vcmp.le.f32.partialorder %v38_v12, 0.7853982 }
  0xc2   :  { %v943_v29 = vadd.s32 4294967294, %v106_v35  ;;  %v767_v47 = vadd.s32 536870912, %v766_v43  ;;  %v273_v51 = vsub.s32 32, %v272_v45  ;;  %v275_v60 = vshll.u32 %v1078_v42, %v272_v45 }
  0xc3   :  { %v278_v63 = vshll.u32 %v1079_v44, %v272_v45  ;;  %v281_v13 = vshll.u32 %v1080_v46, %v272_v45  ;;  %v284_v22 = vshll.u32 %v1081_v48, %v272_v45  ;;  %v287_v17 = vshll.u32 %v1082_v50, %v272_v45 }
  0xc4   :  { %vm944_vm4 = vcmp.lt.s32.totalorder %v943_v29, 0  ;;  %v1268_v59 = vshrl.u32 %v767_v47, 30  ;;  %v276_v62 = vshrl.u32 %v1079_v44, %v273_v51  ;;  %v279_v0 = vshrl.u32 %v1080_v46, %v273_v51 }
  0xc5   :  { %v109_v32 = vsel %vm944_vm4, 0, %v943_v29  ;;  %v282_v5 = vshrl.u32 %v1081_v48, %v273_v51  ;;  %v285_v2 = vshrl.u32 %v1082_v50, %v273_v51  ;;  %v288_v24 = vshrl.u32 %v1083_v58, %v273_v51 }
  0xc6   :  { %v110_v37 = vsub.s32 32, %v109_v32  ;;  %v114_v57 = vsub.s32 4294967266, %v109_v32  ;;  %v111_v61 = vshll.u32 %v102_v7, %v109_v32  ;;  %v769_v4 = vshll.u32 %v1268_v59, 30 }
  0xc7   :  { %v277_v11 = vor.u32 %v276_v62, %v275_v60  ;;  %v280_v6 = vor.u32 %v279_v0, %v278_v63  ;;  %v283_v44 = vor.u32 %v282_v5, %v281_v13  ;;  %v274_v46 = vshrl.u32 %v1078_v42, %v273_v51 }
  0xc8   :  { %v112_v1 = vshrl.u32 %v94_v54, %v110_v37  ;;  %v115_v3 = vadd.s32 127, %v114_v57  ;;  %v1277_v7 = vsub.s32 %v766_v43, %v769_v4  ;;  %vm290_vm6 = vcmp.lt.s32.totalorder %v271_v55, 1 }
  0xc9   :  { %v286_v31 = vor.u32 %v285_v2, %v284_v22  ;;  %v289_v34 = vor.u32 %v288_v24, %v287_v17  ;;  %vm292_vm7 = vcmp.lt.s32.totalorder %v271_v55, 3  ;;  %vm293_vm8 = vcmp.lt.s32.totalorder %v271_v55, 4 }
  0xca   :  { %v113_v16 = vor.u32 %v112_v1, %v111_v61  ;;  %v116_v21 = vshll.u32 %v115_v3, 23  ;;  %v772_v39 = vsub.s32 0, %v1277_v7  ;;  %v298_v33 = vsel %vm290_vm6, %v277_v11, %v280_v6 }
  0xcb   :  { %v295_v36 = vsel %vm293_vm8, %v283_v44, 2102212464  ;;  %v299_v50 = vsel %vm293_vm8, %v286_v31, 920167782  ;;  %v302_v58 = vsel %vm290_vm6, %v280_v6, %v283_v44  ;;  %v303_v38 = vsel %vm293_vm8, %v289_v34, 1326507024 }
  0xcc   :  { %v117_v20 = vor.u32 4788187, %v116_v21  ;;  %v120_v40 = vcvt.s32.f32 %v113_v16  ;;  %v966_v35 = vmin.u32 %v772_v39, %v1277_v7  ;;  %vm291_vm9 = vcmp.lt.s32.totalorder %v271_v55, 2 }
  0xcd   :  { %v300_v42 = vsel %vm292_vm7, %v283_v44, %v299_v50  ;;  %v294_v45 = vsel %vm290_vm6, %v274_v46, %v277_v11  ;;  %v304_v49 = vsel %vm292_vm7, %v286_v31, %v303_v38  ;;  %v124_v51 = vsub.s32 4, %v1241_v56 }
  0xce   :  { %v118_v48 = vand.u32 2147483647, %v117_v20  ;;  %v774_v43 = vclz %v966_v35  ;;  %v301_v47 = vsel %vm291_vm9, %v298_v33, %v300_v42  ;;  %v296_v37 = vsel %vm292_vm7, %v280_v6, %v295_v36 }
  0xcf   :  { %v305_v57 = vsel %vm291_vm9, %v302_v58, %v304_v49  ;;  %v1297_v62 = vmul.u32.u64.low %v306_v15, %v301_v47  ;;  %v1298_v63 = vmul.u32.u64.high %v306_v15, %v301_v47, %v1297_v62  ;;  %v297_v55 = vsel %vm291_vm9, %v294_v45, %v296_v37 }
  0xd0   :  { %v121_v29 = vmul.f32 %v120_v40, %v118_v48  ;;  %v967_v32 = vadd.s32 4294967294, %v774_v43  ;;  %v1294_v60 = vmul.u32.u64.low %v306_v15, %v305_v57  ;;  %v1295_v61 = vmul.u32.u64.high %v306_v15, %v305_v57, %v1294_v60 }
  0xd1   :  { %v554_v4 = vsub.s32 32, %v1263_v41  ;;  %v559_v5 = vadd.s32 127, %v558_v53  ;;  %v125_v11 = vsel %vm40_vm5, %v124_v51, %v1241_v56  ;;  %v316_v12 = vadd.s32 1, %v1298_v63 }
  0xd2   :  { %v122_v54 = vxor.u32 2147483648, %v121_v29  ;;  %vm968_vm10 = vcmp.lt.s32.totalorder %v967_v32, 0  ;;  %vm315_vm12 = vc.u32 %v1295_v61, %v1297_v62  ;;  %v313_v13 = vmul.u32 %v306_v15, %v297_v55 }
  0xd3   :  { %v777_v6 = vsel %vm968_vm10, 0, %v967_v32  ;;  %v538_v16 = vadd.s32 %v1176_v26, %v1173_v25  ;;  %v317_v21 = vsel %vm315_vm12, %v316_v12, %v1298_v63  ;;  %v127_v53 = vsel %vm1305_vm11, 0, %v125_v11 }
  0xd4   :  { %v123_v0 = vsel %vm40_vm5, %v122_v54, %v121_v29  ;;  %v782_v22 = vsub.s32 4294967266, %v777_v6  ;;  %v318_v44 = vadd.s32 %v317_v21, %v313_v13  ;;  %v560_v2 = vshll.u32 %v559_v5, 23 }
  0xd5   :  { %v126_v3 = vsel %vm1305_vm11, %v1115_v9, %v123_v0  ;;  %v556_v56 = vshrl.u32 %v538_v16, %v554_v4  ;;  %v131_v24 = vadd.s32 3, %v127_v53  ;;  %v555_v20 = vshll.u32 %v1228_v27, %v1263_v41 }
  0xd6   :  { %1013 = vcosq.f32 %v126_v3  ;;  %v319_v17 = vadd.s32 536870912, %v318_v44  ;;  %v783_v39 = vadd.s32 127, %v782_v22  ;;  %v561_v40 = vor.u32 4788187, %v560_v2 }
  0xd7   :  { %1015 = vsinq.f32 %v126_v3  ;;  %v557_v15 = vor.u32 %v556_v56, %v555_v20  ;;  %v778_v25 = vsub.s32 32, %v777_v6  ;;  %v132_v31 = vand.u32 3, %v131_v24 }
  0xd8   :  { %v1328_v46 = vshrl.u32 %v319_v17, 30  ;;  %v237_v34 = vand.u32 3, %v127_v53  ;;  %v762_v48 = vadd.s32 %v1249_v23, %v1254_v52  ;;  %v784_v35 = vshll.u32 %v783_v39, 23 }
  0xd9   :  { %vm142_vm13 = vcmask 123904   ;;  %v562_v50 = vand.u32 2147483647, %v561_v40  ;;  %v564_v58 = vcvt.s32.f32 %v557_v15  ;;  %v779_v27 = vshll.u32 %v1277_v7, %v777_v6 }
  0xda   :  { %v321_v26 = vshll.u32 %v1328_v46, 30  ;;  %vm130_vm14 = vweird.f32 %v1115_v9  ;;  %v780_v38 = vshrl.u32 %v762_v48, %v778_v25  ;;  %vm134_vm15 = vcmp.eq.s32.totalorder %v132_v31, 0 }
  0xdb   :  { %vm137_vm0 = vcmp.eq.s32.totalorder %v132_v31, 2  ;;  %vm239_vm1 = vcmp.eq.s32.totalorder %v237_v34, 0  ;;  %vm242_vm2 = vcmp.eq.s32.totalorder %v237_v34, 2  ;;  %v785_v23 = vor.u32 4788187, %v784_v35 }
  0xdc   :  { %v322_v33 = vsub.s32 %v318_v44, %v321_v26  ;;  %vm133_vm3 = vcmp.lt.s32.totalorder %v132_v31, 2  ;;  %vm238_vm4 = vcmp.lt.s32.totalorder %v237_v34, 2  ;;  %v781_v7 = vor.u32 %v780_v38, %v779_v27 }
  0xdd   :  { %v565_v57 = vmul.f32 %v564_v58, %v562_v50  ;;  %v786_v0 = vand.u32 2147483647, %v785_v23  ;;  %v314_v11 = vadd.s32 %v1297_v62, %v1295_v61  ;;  %vm484_vm6 = vcmp.lt.s32.totalorder %v1113_v8, 0 }
  0xde   :  { %v324_v29 = vsub.s32 0, %v322_v33  ;;  %v788_v55 = vcvt.s32.f32 %v781_v7  ;;  %vm1347_vm7 = vcmp.le.f32.partialorder %v482_v10, 0.7853982  ;;  %vm708_vm8 = vcmp.lt.s32.totalorder %v1125_v19, 0 }
  0xdf   :  { %v566_v3 = vxor.u32 2147483648, %v565_v57  ;;  %v568_v39 = vsub.s32 4, %v1212_v14  ;;  %vm1360_vm9 = vcmp.le.f32.partialorder %v706_v28, 0.7853982  ;;  %v344_v25 = vsub.s32 4, %v1328_v46 }
  0xe0   :  { %v950_v52 = vmin.u32 %v324_v29, %v322_v33  ;;  %v789_v5 = vmul.f32 %v788_v55, %v786_v0  ;;  %vm260_vm10 = vcmp.lt.s32.totalorder %v1129_v30, 0  ;;  %vm259_vm11 = vcmp.le.f32.partialorder %v258_v18, 0.7853982 }
  0xe1   :  { %v567_v21 = vsel %vm484_vm6, %v566_v3, %v565_v57  ;;  %v569_v28 = vsel %vm484_vm6, %v568_v39, %v1212_v14  ;;  %v792_v34 = vsub.s32 4, %v1268_v59  ;;  %v345_v48 = vsel %vm260_vm10, %v344_v25, %v1328_v46 }
  0xe2   :  { %v326_v54 = vclz %v950_v52  ;;  %v790_v53 = vxor.u32 2147483648, %v789_v5  ;;  %v570_v61 = vsel %vm1347_vm7, %v1113_v8, %v567_v21  ;;  %v571_v35 = vsel %vm1347_vm7, 0, %v569_v28 }
  0xe3   :  { %v1014_v36 = vpop.eup %1013  ;;  %1017 = vcosq.f32 %v570_v61  ;;  %v793_v18 = vsel %vm708_vm8, %v792_v34, %v1268_v59  ;;  %v685_v38 = vand.u32 3, %v571_v35  ;;  %vm350_vm12 = vweird.f32 %v1129_v30 }
  0xe4   :  { %v1016_v41 = vpop.eup %1015  ;;  %v138_v43 = vxor.u32 2147483648, %v1014_v36  ;;  %v951_v1 = vadd.s32 4294967294, %v326_v54  ;;  %v791_v62 = vsel %vm708_vm8, %v790_v53, %v789_v5  ;;  %1019 = vsinq.f32 %v570_v61 }
  0xe5   :  { %v135_v42 = vxor.u32 2147483648, %v1016_v41  ;;  %v794_v15 = vsel %vm1360_vm9, %v1125_v19, %v791_v62  ;;  %v795_v50 = vsel %vm1360_vm9, 0, %v793_v18  ;;  %vm686_vm8 = vcmp.lt.s32.totalorder %v685_v38, 2 }
  0xe6   :  { %v244_v45 = vsel %vm242_vm2, %v138_v43, %v1016_v41  ;;  %v139_v47 = vsel %vm137_vm0, %v138_v43, %v1016_v41  ;;  %vm952_vm5 = vcmp.lt.s32.totalorder %v951_v1, 0  ;;  %1021 = vcosq.f32 %v794_v15 }
  0xe7   :  { %v241_v49 = vsel %vm239_vm1, %v1014_v36, %v135_v42  ;;  %v136_v51 = vsel %vm134_vm15, %v1014_v36, %v135_v42  ;;  %v329_v4 = vsel %vm952_vm5, 0, %v951_v1  ;;  %1023 = vsinq.f32 %v794_v15 }
  0xe8   :  { %v245_v32 = vsel %vm238_vm4, %v241_v49, %v244_v45  ;;  %v140_v37 = vsel %vm133_vm3, %v136_v51, %v139_v47  ;;  %v330_v6 = vsub.s32 32, %v329_v4  ;;  %v334_v12 = vsub.s32 4294967266, %v329_v4 }
  0xe9   :  { %v246_v60 = vsel %vm130_vm14, nan, %v245_v32  ;;  %v141_v63 = vsel %vm130_vm14, nan, %v140_v37  ;;  %v331_v13 = vshll.u32 %v322_v33, %v329_v4  ;;  %v347_v33 = vsel %vm259_vm11, 0, %v345_v48 }
  0xea   :  { %248 = vrot.lane.b32.xlu1 %v246_v60, %s1084_s0  ;;  %143 = vst.msk [vmem:[#allocation5] sm:$0x3] %vm142_vm13, %v141_v63  ;;  %v332_v16 = vshrl.u32 %v314_v11, %v330_v6  ;;  %v335_v9 = vadd.s32 127, %v334_v12  ;;  %v575_v36 = vadd.s32 3, %v571_v35  ;;  %v351_v14 = vadd.s32 3, %v347_v33 }
  0xeb   :  { %v461_v46 = vand.u32 3, %v347_v33  ;;  %v799_v29 = vadd.s32 3, %v795_v50  ;;  %vm687_vm15 = vcmp.eq.s32.totalorder %v685_v38, 0  ;;  %vm690_vm0 = vcmp.eq.s32.totalorder %v685_v38, 2 }
  0xec   :  { %v333_v22 = vor.u32 %v332_v16, %v331_v13  ;;  %v336_v44 = vshll.u32 %v335_v9, 23  ;;  %v576_v41 = vand.u32 3, %v575_v36  ;;  %v352_v43 = vand.u32 3, %v351_v14 }
  0xed   :  { %vm462_vm1 = vcmp.lt.s32.totalorder %v461_v46, 2  ;;  %vm463_vm2 = vcmp.eq.s32.totalorder %v461_v46, 0  ;;  %v800_v47 = vand.u32 3, %v799_v29  ;;  %v909_v49 = vand.u32 3, %v795_v50 }
  0xee   :  { %v337_v56 = vor.u32 4788187, %v336_v44  ;;  %v340_v24 = vcvt.s32.f32 %v333_v22  ;;  %vm578_vm13 = vcmp.eq.s32.totalorder %v576_v41, 0  ;;  %vm581_vm14 = vcmp.eq.s32.totalorder %v576_v41, 2 }
  0xef   :  { %vm353_vm3 = vcmp.lt.s32.totalorder %v352_v43, 2  ;;  %vm354_vm4 = vcmp.eq.s32.totalorder %v352_v43, 0  ;;  %vm357_vm5 = vcmp.eq.s32.totalorder %v352_v43, 2  ;;  %vm466_vm6 = vcmp.eq.s32.totalorder %v461_v46, 2 }
  0xf0   :  { %v338_v17 = vand.u32 2147483647, %v337_v56  ;;  %v1018_v58 = vpop.eup %1017  ;;  %vm577_vm7 = vcmp.lt.s32.totalorder %v576_v41, 2  ;;  %vm911_vm9 = vcmp.eq.s32.totalorder %v909_v49, 0 }
  0xf1   :  { %v1020_v27 = vpop.eup %1019  ;;  %v582_v52 = vxor.u32 2147483648, %v1018_v58 }
  0xf2   :  { %v341_v20 = vmul.f32 %v340_v24, %v338_v17  ;;  %v579_v23 = vxor.u32 2147483648, %v1020_v27 }
  0xf3   :  { %v1022_v42 = vpop.eup %1021  ;;  %v583_v37 = vsel %vm581_vm14, %v582_v52, %v1020_v27  ;;  %v692_v0 = vsel %vm690_vm0, %v582_v52, %v1020_v27  ;;  %vm574_vm14 = vweird.f32 %v1113_v8  ;;  %vm798_vm0 = vweird.f32 %v1125_v19 }
  0xf4   :  { %v342_v40 = vxor.u32 2147483648, %v341_v20  ;;  %v1024_v45 = vpop.eup %1023  ;;  %v580_v32 = vsel %vm578_vm13, %v1018_v58, %v579_v23  ;;  %v689_v63 = vsel %vm687_vm15, %v1018_v58, %v579_v23  ;;  %v806_v4 = vxor.u32 2147483648, %v1022_v42 }
  0xf5   :  { %v803_v3 = vxor.u32 2147483648, %v1024_v45  ;;  %v584_v13 = vsel %vm577_vm7, %v580_v32, %v583_v37  ;;  %v693_v16 = vsel %vm686_vm8, %v689_v63, %v692_v0  ;;  %vm805_vm13 = vcmp.eq.s32.totalorder %v800_v47, 2 }
  0xf6   :  { %v343_v26 = vsel %vm260_vm10, %v342_v40, %v341_v20  ;;  %vm914_vm10 = vcmp.eq.s32.totalorder %v909_v49, 2  ;;  %v807_v21 = vsel %vm805_vm13, %v806_v4, %v1024_v45  ;;  %v585_v44 = vsel %vm574_vm14, nan, %v584_v13 }
  0xf7   :  { %v346_v31 = vsel %vm259_vm11, %v1129_v30, %v343_v26  ;;  %vm802_vm11 = vcmp.eq.s32.totalorder %v800_v47, 0  ;;  %v913_v53 = vsel %vm911_vm9, %v1022_v42, %v803_v3  ;;  %v916_v22 = vsel %vm914_vm10, %v806_v4, %v1024_v45 }
  0xf8   :  { %1025 = vcosq.f32 %v346_v31  ;;  %v804_v9 = vsel %vm802_vm11, %v1022_v42, %v803_v3  ;;  %v694_v56 = vsel %vm574_vm14, nan, %v693_v16  ;;  %vm801_vm15 = vcmp.lt.s32.totalorder %v800_v47, 2 }
  0xf9   :  { %1027 = vsinq.f32 %v346_v31  ;;  %v808_v30 = vsel %vm801_vm15, %v804_v9, %v807_v21  ;;  %vm923_vm7 = vcmask 1042304  }
  0xfa   :  { %v809_v61 = vsel %vm798_vm0, nan, %v808_v30 }
 0x105   :  { %v1026_v59 = vpop.eup %1025 }
 0x106   :  { %v1028_v51 = vpop.eup %1027  ;;  %v358_v7 = vxor.u32 2147483648, %v1026_v59 }
 0x107   :  { %v355_v54 = vxor.u32 2147483648, %v1028_v51 }
 0x108   :  { %v359_v57 = vsel %vm357_vm5, %v358_v7, %v1028_v51  ;;  %v468_v60 = vsel %vm466_vm6, %v358_v7, %v1028_v51  ;;  %vm699_vm5 = vcmask 779904   ;;  %vm814_vm6 = vcmask 911104  }
 0x109   :  { %v356_v1 = vsel %vm354_vm4, %v1026_v59, %v355_v54  ;;  %v465_v55 = vsel %vm463_vm2, %v1026_v59, %v355_v54  ;;  %vm366_vm2 = vcmask 386304   ;;  %vm590_vm4 = vcmask 648704  }
 0x10a   :  { %v360_v5 = vsel %vm353_vm3, %v356_v1, %v359_v57  ;;  %v469_v11 = vsel %vm462_vm1, %v465_v55, %v468_v60  ;;  %vm251_vm1 = vcmask 255104   ;;  %vm475_vm3 = vcmask 517504  }
 0x10b   :  { %v361_v6 = vsel %vm350_vm12, nan, %v360_v5  ;;  %v470_v12 = vsel %vm350_vm12, nan, %v469_v11  ;;  %vm910_vm12 = vcmp.lt.s32.totalorder %v909_v49, 2 }
 0x10c   :  { %363 = vrot.lane.b32.xlu0 %v361_v6, %s1085_s1  ;;  %472 = vrot.lane.b32.xlu1 %v470_v12, %s1086_s16  ;;  %v917_v2 = vsel %vm910_vm12, %v913_v53, %v916_v22 }
 0x10d   :  { %v918_v62 = vsel %vm798_vm0, nan, %v917_v2 }
 0x110   :  { %587 = vrot.lane.b32.xlu0 %v585_v44, %s1087_s17  ;;  %696 = vrot.lane.b32.xlu1 %v694_v56, %s1088_s18 }
 0x114   :  { %811 = vrot.lane.b32.xlu0 %v809_v61, %s1089_s19  ;;  %920 = vrot.lane.b32.xlu1 %v918_v62, %s1090_s20 }
 0x15c   :  { %v249_v8 = vpop.permute.xlu1 %248 }
 0x15d   :  { %252 = vst.msk [vmem:[#allocation5] sm:$0x3] %vm251_vm1, %v249_v8 }
 0x17e   :  { %v364_v17 = vpop.permute.xlu0 %363  ;;  %v473_v24 = vpop.permute.xlu1 %472 }
 0x17f   :  { %367 = vst.msk [vmem:[#allocation5] sm:$0x3] %vm366_vm2, %v364_v17 }
 0x180   :  { %476 = vst.msk [vmem:[#allocation5] sm:$0x3] %vm475_vm3, %v473_v24 }
 0x182   :  { %v588_v20 = vpop.permute.xlu0 %587  ;;  %v697_v39 = vpop.permute.xlu1 %696 }
 0x183   :  { %591 = vst.msk [vmem:[#allocation5] sm:$0x3] %vm590_vm4, %v588_v20 }
 0x184   :  { %700 = vst.msk [vmem:[#allocation5] sm:$0x3] %vm699_vm5, %v697_v39 }
 0x186   :  { %v812_v19 = vpop.permute.xlu0 %811  ;;  %v921_v10 = vpop.permute.xlu1 %920 }
 0x187   :  { %815 = vst.msk [vmem:[#allocation5] sm:$0x3] %vm814_vm6, %v812_v19 }
 0x188   :  { %924 = vst.msk [vmem:[#allocation5] sm:$0x3] %vm923_vm7, %v921_v10 }
 0x189   :  { %1060 = shalt.err (!%p1057_p9)
}
 0x18a   :  { %934 = dma.vmem_to_hbm [thread:$0]  %s932_s22, 32, %s1403_s2, [#allocation4]  }
 0x18b   :  { %1071 = dma.done.wait [#allocation4], 32  }
 0x18c   :  { %1072 = vsyncadd [#allocation4], 4294967264 }
 0x18d   :  { %938 = vsyncpa [#allocation3], 1 }
 0x18e   :  { %939 = vsyncpa [#allocation4], 1 }

</bundles_post_ra>
